<compile_context>
chip_gen: v7x
topology: tpu7x:2x2x1
jax: 0.10.0
libtpu: 0.0.40
codegen_flags: <defaults>
</compile_context>

<pallas_src>
import jax
import jax.numpy as jnp
from jax.experimental import pallas as pl
from jax.experimental.pallas import tpu as pltpu


def policy_net_kernel(xt_ref, w1t_ref, b1t_ref, w2t_ref, b2t_ref, o_ref):
    # fc1 on the MXU: (H, S) @ (S, TB) -> (H, TB), then bias + ReLU on the VPU.
    h = jnp.dot(w1t_ref[...], xt_ref[...],
                preferred_element_type=jnp.float32,
                precision=jax.lax.Precision.HIGHEST)
    h = jnp.maximum(h + b1t_ref[...], 0.0)                  # (H, TB)

    # fc2 on the MXU: (A8, H) @ (H, TB) -> (A8, TB); padded rows get -1e30 bias.
    logits = jnp.dot(w2t_ref[...], h,
                     preferred_element_type=jnp.float32,
                     precision=jax.lax.Precision.HIGHEST)
    logits = logits + b2t_ref[...]                           # (A8, TB)

    # Softmax over the (tiny) sublane action axis; padded rows contribute 0.
    m = jnp.max(logits, axis=0, keepdims=True)               # (1, TB)
    e = jnp.exp(logits - m)                                   # EUP
    denom = jnp.sum(e, axis=0, keepdims=True)                 # (1, TB)
    r = pl.reciprocal(denom, approx=True)                     # EUP slot
    r = r * (2.0 - denom * r)                                 # Newton-Raphson -> ~f32 exact
    o_ref[...] = (e * r).astype(o_ref.dtype)


def policy_net_forward(x, w1, b1, w2, b2, *, tb=None):
    """x: (B, state_dim); w1: (S, H); b1: (1, H); w2: (H, A); b2: (1, A)."""
    B, S = x.shape
    H = w1.shape[1]
    A = w2.shape[1]

    # Pad action dim to a sublane multiple (>= 8). Padded rows: zero weights,
    # -1e30 bias -> exp underflows to exactly 0 under softmax.
    A8 = max(8, ((A + 7) // 8) * 8)

    xt = x.T                                                  # (S, B)
    w1t = w1.T                                                # (H, S)
    b1t = b1.reshape(H, 1)                                    # column bias
    w2t = jnp.zeros((A8, H), w2.dtype).at[:A, :].set(w2.T)    # (A8, H)
    b2t = jnp.full((A8, 1), -1e30, b2.dtype).at[:A, :].set(b2.reshape(A, 1))

    # Batch tile on the lane axis: multiple of 128; for large B aim for >= 4
    # grid steps (keeps both v7x TensorCores busy), capped at 1024 per tile.
    if tb is None:
        target = -(-B // 4)
        tb = max(128, min(1024, ((target + 127) // 128) * 128))
    B_pad = ((B + tb - 1) // tb) * tb
    if B_pad != B:
        xt = jnp.pad(xt, ((0, 0), (0, B_pad - B)))

    out_t = pl.pallas_call(
        policy_net_kernel,
        out_shape=jax.ShapeDtypeStruct((A8, B_pad), jnp.float32),
        grid=(B_pad // tb,),
        in_specs=[
            pl.BlockSpec((S, tb), lambda i: (0, i)),          # x^T streamed per batch tile
            pl.BlockSpec((H, S), lambda i: (0, 0)),           # w1^T VMEM-resident
            pl.BlockSpec((H, 1), lambda i: (0, 0)),           # b1 column, resident
            pl.BlockSpec((A8, H), lambda i: (0, 0)),          # w2^T padded, resident
            pl.BlockSpec((A8, 1), lambda i: (0, 0)),          # b2 column padded, resident
        ],
        out_specs=pl.BlockSpec((A8, tb), lambda i: (0, i)),
        compiler_params=pltpu.CompilerParams(
            dimension_semantics=("parallel",),                # megacore sharding on v7x
        ),
    )(xt, w1t, b1t, w2t, b2t)

    # Slice real action rows / batch columns, back to (B, A) PyTorch orientation.
    return out_t[:A, :B].T


def init_params(key, state_dim, hidden_dim, action_dim):
    # Deterministic init mimicking torch.nn.Linear default: U(-1/sqrt(fan_in), 1/sqrt(fan_in))
    k1, k2, k3, k4 = jax.random.split(key, 4)
    bound1 = 1.0 / jnp.sqrt(jnp.float32(state_dim))
    bound2 = 1.0 / jnp.sqrt(jnp.float32(hidden_dim))
    w1 = jax.random.uniform(k1, (state_dim, hidden_dim), jnp.float32, -bound1, bound1)
    b1 = jax.random.uniform(k2, (1, hidden_dim), jnp.float32, -bound1, bound1)
    w2 = jax.random.uniform(k3, (hidden_dim, action_dim), jnp.float32, -bound2, bound2)
    b2 = jax.random.uniform(k4, (1, action_dim), jnp.float32, -bound2, bound2)
    return w1, b1, w2, b2


def _reference(x, w1, b1, w2, b2):
    hp = jax.lax.Precision.HIGHEST
    h = jnp.maximum(jnp.dot(x, w1, precision=hp) + b1, 0.0)
    return jax.nn.softmax(jnp.dot(h, w2, precision=hp) + b2, axis=1)


if __name__ == "__main__":
    # CartPole-v0: state_dim=4, action_dim=2; hidden_dim=128 per the module.
    batch, state_dim, hidden_dim, action_dim = 2, 4, 128, 2
    key = jax.random.PRNGKey(0)
    kx, kp = jax.random.split(key)
    x = jax.random.normal(kx, (batch, state_dim), jnp.float32)
    w1, b1, w2, b2 = init_params(kp, state_dim, hidden_dim, action_dim)

    out = jax.block_until_ready(policy_net_forward(x, w1, b1, w2, b2))
    ref = _reference(x, w1, b1, w2, b2)
    assert out.shape == (batch, action_dim)
    assert jnp.allclose(out, ref, atol=1e-5), "mismatch vs reference"
    assert jnp.allclose(jnp.sum(out, axis=1), 1.0, atol=1e-5)

    # Larger, non-multiple-of-tile batch exercising the multi-step grid path.
    big_B = 300
    xb = jax.random.normal(jax.random.PRNGKey(1), (big_B, state_dim), jnp.float32)
    outb = jax.block_until_ready(policy_net_forward(xb, w1, b1, w2, b2))
    refb = _reference(xb, w1, b1, w2, b2)
    assert outb.shape == (big_B, action_dim)
    assert jnp.allclose(outb, refb, atol=1e-5), "mismatch vs reference (big batch)"

    print("KERNEL_OK")
</pallas_src>

<mosaic_0001>
module attributes {stable_mosaic.version = 11 : i64} {
  func.func @policy_net_kernel(%arg0: i32, %arg1: memref<4x128xf32, #tpu.memory_space<vmem>>, %arg2: memref<128x4xf32, #tpu.memory_space<vmem>>, %arg3: memref<128x1xf32, #tpu.memory_space<vmem>>, %arg4: memref<8x128xf32, #tpu.memory_space<vmem>>, %arg5: memref<8x1xf32, #tpu.memory_space<vmem>>, %arg6: memref<8x128xf32, #tpu.memory_space<vmem>>) attributes {dimension_semantics = [#tpu.dimension_semantics<parallel>], iteration_bounds = array<i64: 1>, scalar_prefetch = 0 : i64, scratch_operands = 0 : i64, tpu.core_type = #tpu.core_type<tc>, window_params = [{transform_indices = @transform_0, window_bounds = array<i64: 4, 128>}, {pipeline_mode = #tpu.pipeline_mode<synchronous>, transform_indices = @transform_1, window_bounds = array<i64: 128, 4>}, {pipeline_mode = #tpu.pipeline_mode<synchronous>, transform_indices = @transform_2, window_bounds = array<i64: 128, 1>}, {pipeline_mode = #tpu.pipeline_mode<synchronous>, transform_indices = @transform_3, window_bounds = array<i64: 8, 128>}, {pipeline_mode = #tpu.pipeline_mode<synchronous>, transform_indices = @transform_4, window_bounds = array<i64: 8, 1>}, {transform_indices = @transform_5, window_bounds = array<i64: 8, 128>}]} {
    %c0 = arith.constant 0 : index
    %c0_0 = arith.constant 0 : index
    %0 = vector.load %arg2[%c0, %c0_0] : memref<128x4xf32, #tpu.memory_space<vmem>>, vector<128x4xf32>
    %c0_1 = arith.constant 0 : index
    %c0_2 = arith.constant 0 : index
    %1 = vector.load %arg1[%c0_1, %c0_2] : memref<4x128xf32, #tpu.memory_space<vmem>>, vector<4x128xf32>
    %cst = arith.constant dense<0.000000e+00> : vector<128x128xf32>
    %2 = tpu.matmul %0, %1, %cst {dimension_numbers = #tpu.dot_dimension_numbers<[1], [0], [0], [1], [0, 0, 1, 1], [], []>, precision = #tpu.contract_precision<fp32>} : vector<128x4xf32>, vector<4x128xf32>, vector<128x128xf32> -> vector<128x128xf32>
    %c0_3 = arith.constant 0 : index
    %c0_4 = arith.constant 0 : index
    %3 = vector.load %arg3[%c0_3, %c0_4] : memref<128x1xf32, #tpu.memory_space<vmem>>, vector<128x1xf32>
    %4 = vector.broadcast %3 : vector<128x1xf32> to vector<128x128xf32>
    %5 = arith.addf %2, %4 : vector<128x128xf32>
    %cst_5 = arith.constant 0.000000e+00 : f32
    %6 = vector.broadcast %cst_5 : f32 to vector<128x128xf32>
    %7 = arith.maximumf %5, %6 : vector<128x128xf32>
    %c0_6 = arith.constant 0 : index
    %c0_7 = arith.constant 0 : index
    %8 = vector.load %arg4[%c0_6, %c0_7] : memref<8x128xf32, #tpu.memory_space<vmem>>, vector<8x128xf32>
    %cst_8 = arith.constant dense<0.000000e+00> : vector<8x128xf32>
    %9 = tpu.matmul %8, %7, %cst_8 {dimension_numbers = #tpu.dot_dimension_numbers<[1], [0], [0], [1], [0, 0, 1, 1], [], []>, precision = #tpu.contract_precision<fp32>} : vector<8x128xf32>, vector<128x128xf32>, vector<8x128xf32> -> vector<8x128xf32>
    %c0_9 = arith.constant 0 : index
    %c0_10 = arith.constant 0 : index
    %10 = vector.load %arg5[%c0_9, %c0_10] : memref<8x1xf32, #tpu.memory_space<vmem>>, vector<8x1xf32>
    %11 = vector.broadcast %10 : vector<8x1xf32> to vector<8x128xf32>
    %12 = arith.addf %9, %11 : vector<8x128xf32>
    %cst_11 = arith.constant dense<0xFF800000> : vector<128xf32>
    %13 = vector.multi_reduction <maximumf>, %12, %cst_11 [0] : vector<8x128xf32> to vector<128xf32>
    %14 = vector.shape_cast %13 : vector<128xf32> to vector<1x128xf32>
    %15 = vector.broadcast %14 : vector<1x128xf32> to vector<8x128xf32>
    %16 = arith.subf %12, %15 : vector<8x128xf32>
    %17 = math.exp %16 : vector<8x128xf32>
    %cst_12 = arith.constant dense<0.000000e+00> : vector<128xf32>
    %18 = vector.multi_reduction <add>, %17, %cst_12 [0] : vector<8x128xf32> to vector<128xf32>
    %19 = vector.shape_cast %18 : vector<128xf32> to vector<1x128xf32>
    %20 = tpu.reciprocal %19 {approx = true} : vector<1x128xf32> -> vector<1x128xf32>
    %21 = arith.mulf %19, %20 : vector<1x128xf32>
    %cst_13 = arith.constant 2.000000e+00 : f32
    %22 = vector.broadcast %cst_13 : f32 to vector<1x128xf32>
    %23 = arith.subf %22, %21 : vector<1x128xf32>
    %24 = arith.mulf %20, %23 : vector<1x128xf32>
    %25 = vector.broadcast %24 : vector<1x128xf32> to vector<8x128xf32>
    %26 = arith.mulf %17, %25 : vector<8x128xf32>
    %c0_14 = arith.constant 0 : index
    %c0_15 = arith.constant 0 : index
    %27 = vector.load %arg6[%c0_14, %c0_15] : memref<8x128xf32, #tpu.memory_space<vmem>>, vector<8x128xf32>
    tpu.vector_store %arg6[%c0_14, %c0_15], %26 {strides = array<i32>} : memref<8x128xf32, #tpu.memory_space<vmem>>, vector<8x128xf32>,
    return
  }
  func.func @transform_0(%arg0: i32) -> (i32, i32) {
    %c0_i32 = arith.constant 0 : i32
    %c0_i32_0 = arith.constant 0 : i32
    return %c0_i32, %arg0 : i32, i32
  }
  func.func @transform_1(%arg0: i32) -> (i32, i32) {
    %c0_i32 = arith.constant 0 : i32
    %c0_i32_0 = arith.constant 0 : i32
    %c0_i32_1 = arith.constant 0 : i32
    return %c0_i32, %c0_i32_0 : i32, i32
  }
  func.func @transform_2(%arg0: i32) -> (i32, i32) {
    %c0_i32 = arith.constant 0 : i32
    %c0_i32_0 = arith.constant 0 : i32
    %c0_i32_1 = arith.constant 0 : i32
    return %c0_i32, %c0_i32_0 : i32, i32
  }
  func.func @transform_3(%arg0: i32) -> (i32, i32) {
    %c0_i32 = arith.constant 0 : i32
    %c0_i32_0 = arith.constant 0 : i32
    %c0_i32_1 = arith.constant 0 : i32
    return %c0_i32, %c0_i32_0 : i32, i32
  }
  func.func @transform_4(%arg0: i32) -> (i32, i32) {
    %c0_i32 = arith.constant 0 : i32
    %c0_i32_0 = arith.constant 0 : i32
    %c0_i32_1 = arith.constant 0 : i32
    return %c0_i32, %c0_i32_0 : i32, i32
  }
  func.func @transform_5(%arg0: i32) -> (i32, i32) {
    %c0_i32 = arith.constant 0 : i32
    %c0_i32_0 = arith.constant 0 : i32
    return %c0_i32, %arg0 : i32, i32
  }
}

</mosaic_0001>

<bundles_post_ra>
// kernel: tpu_custom_call.1
= control target key start
LH: loop header
LB: loop body
LE: loop exit
PB: predicated region body
PF: predicated region fallthrough
CT: control target
= control target key end

     0   :  { %vm183_vm0 = vcmask 1043456   ;;  %vm134_vm1 = vcmask 31744   ;;  %s3535_s0 = inlined_call_operand.vmem [shape: f32[4,128], index: 0, kind: input, shape index: {}]   ;;  %s3536_s1 = inlined_call_operand.vmem [shape: f32[128,4], index: 1, kind: input, shape index: {}]   ;;  %s3537_s2 = inlined_call_operand.vmem [shape: f32[128,1], index: 2, kind: input, shape index: {}]   ;;  %s3538_s3 = inlined_call_operand.vmem [shape: f32[8,128], index: 3, kind: input, shape index: {}]   ;;  %s3539_s4 = inlined_call_operand.vmem [shape: f32[8,1], index: 4, kind: input, shape index: {}]   ;;  %s3540_s5 = inlined_call_operand.hbm [shape: f32[8,128], index: 5, kind: output, shape index: {}]  }
   0x1   :  { %v37_v0 = vld [vmem:[%s3535_s0] sm:$0xf]  ;;  %v22_v2 = vld [vmem:[%s3536_s1 + $0x8] sm:$0xff]  ;;  %v23_v6 = vld [vmem:[%s3536_s1 + $0x10] sm:$0xff] }
   0x2   :  { %v21_v1 = vld [vmem:[%s3536_s1] sm:$0xff]  ;;  %v185_v3 = vsel %vm183_vm0, %v37_v0, 0  ;;  %v139_v5 = vsel %vm134_vm1, %v22_v2, 0  ;;  %v24_v7 = vld [vmem:[%s3536_s1 + $0x18] sm:$0xff]  ;;  %v142_v12 = vsel %vm134_vm1, %v23_v6, 0  ;;  %v26_v13 = vld [vmem:[%s3536_s1 + $0x28] sm:$0xff] }
   0x3   :  { %v136_v4 = vsel %vm134_vm1, %v21_v1, 0  ;;  %v25_v8 = vld [vmem:[%s3536_s1 + $0x20] sm:$0xff]  ;;  %v2888_v9 = vand.u32 4294901760, %v185_v3  ;;  %v2892_v11 = vand.u32 4294901760, %v139_v5  ;;  %v27_v14 = vld [vmem:[%s3536_s1 + $0x30] sm:$0xff]  ;;  %v2901_v15 = vand.u32 4294901760, %v142_v12 }
   0x4   :  { %v2890_v10 = vand.u32 4294901760, %v136_v4  ;;  %v145_v16 = vsel %vm134_vm1, %v24_v7, 0  ;;  %v148_v17 = vsel %vm134_vm1, %v25_v8, 0  ;;  %v151_v18 = vsel %vm134_vm1, %v26_v13, 0 }
   0x5   :  { %2181 = vmatprep.subr.mxu0 %v2888_v9  ;;  %v2911_v20 = vsub.f32 %v185_v3, %v2888_v9  ;;  %v2914_v21 = vsub.f32 %v139_v5, %v2892_v11  ;;  %v2916_v22 = vand.u32 4294901760, %v145_v16  ;;  %v2920_v23 = vsub.f32 %v142_v12, %v2901_v15 }
   0x6   :  { %v2908_v19 = vsub.f32 %v136_v4, %v2890_v10  ;;  %2182 = vmatpush3.msra.mxu0 %v2888_v9  ;;  %v2922_v24 = vand.u32 4294901760, %v148_v17  ;;  %v2924_v25 = vand.u32 4294901760, %v151_v18  ;;  %v154_v26 = vsel %vm134_vm1, %v27_v14, 0 }
   0x7   :  { %v2929_v28 = vand.u32 4294901760, %v2911_v20  ;;  %v265_v29 = vand.u32 4294901760, %v2914_v21  ;;  %v2933_v30 = vsub.f32 %v145_v16, %v2916_v22 }
   0x8   :  { %v255_v27 = vand.u32 4294901760, %v2908_v19 }
   0x9   :  { %10 = vsyncpa [#allocation3], 0  ;;  %v275_v31 = vand.u32 4294901760, %v2920_v23  ;;  %v2937_v32 = vsub.f32 %v148_v17, %v2922_v24  ;;  %v2940_v33 = vsub.f32 %v151_v18, %v2924_v25  ;;  %v2942_v34 = vand.u32 4294901760, %v154_v26  ;;  %v28_v43 = vld [vmem:[%s3536_s1 + $0x38] sm:$0xff]  ;;  %v29_v44 = vld [vmem:[%s3536_s1 + $0x40] sm:$0xff] }
   0xa   :  { %v256_v35 = vsub.f32 %v2908_v19, %v255_v27  ;;  %v417_v36 = vsub.f32 %v2911_v20, %v2929_v28  ;;  %v266_v37 = vsub.f32 %v2914_v21, %v265_v29  ;;  %v285_v38 = vand.u32 4294901760, %v2933_v30  ;;  %v30_v45 = vld [vmem:[%s3536_s1 + $0x48] sm:$0xff]  ;;  %v31_v54 = vld [vmem:[%s3536_s1 + $0x50] sm:$0xff]  ;;  %v32_v55 = vld [vmem:[%s3536_s1 + $0x58] sm:$0xff] }
   0xb   :  { %v276_v39 = vsub.f32 %v2920_v23, %v275_v31  ;;  %v295_v40 = vand.u32 4294901760, %v2937_v32  ;;  %v305_v41 = vand.u32 4294901760, %v2940_v33  ;;  %v2959_v42 = vsub.f32 %v154_v26, %v2942_v34  ;;  %v33_v0 = vld [vmem:[%s3536_s1 + $0x60] sm:$0xff]  ;;  %v34_v1 = vld [vmem:[%s3536_s1 + $0x68] sm:$0xff]  ;;  %v35_v13 = vld [vmem:[%s3536_s1 + $0x70] sm:$0xff] }
   0xc   :  { %v257_v46 = vand.u32 4294901760, %v256_v35  ;;  %v418_v47 = vand.u32 4294901760, %v417_v36  ;;  %v267_v48 = vand.u32 4294901760, %v266_v37  ;;  %v286_v49 = vsub.f32 %v2933_v30, %v285_v38 }
   0xd   :  { %v277_v50 = vand.u32 4294901760, %v276_v39  ;;  %v296_v51 = vsub.f32 %v2937_v32, %v295_v40  ;;  %v306_v52 = vsub.f32 %v2940_v33, %v305_v41  ;;  %v315_v53 = vand.u32 4294901760, %v2959_v42 }
   0xe   :  { %2183 = vmatprep.mubr.f32.mxu0 %v257_v46  ;;  %2207 = vmatprep.subr.mxu0 %v418_v47  ;;  %v287_v56 = vand.u32 4294901760, %v286_v49  ;;  %v157_v57 = vsel %vm134_vm1, %v28_v43, 0  ;;  %v160_v58 = vsel %vm134_vm1, %v29_v44, 0  ;;  %v163_v59 = vsel %vm134_vm1, %v30_v45, 0 }
   0xf   :  { %2184 = vmatmul.mubr.f32.vlgmr.msra.gmra.mrb[0].mxu0 %v267_v48  ;;  %v297_v60 = vand.u32 4294901760, %v296_v51  ;;  %v307_v61 = vand.u32 4294901760, %v306_v52  ;;  %v316_v62 = vsub.f32 %v2959_v42, %v315_v53  ;;  %v2992_v63 = vand.u32 4294901760, %v157_v57  ;;  %v36_v51 = vld [vmem:[%s3536_s1 + $0x78] sm:$0xff] }
  0x10   :  { %2208 = vmatpush3.msra.mxu0 %v418_v47  ;;  %2186 = vmatprep.mubr.f32.mxu0 %v277_v50  ;;  %v3000_v2 = vand.u32 4294901760, %v160_v58  ;;  %v3002_v3 = vand.u32 4294901760, %v163_v59  ;;  %v166_v4 = vsel %vm134_vm1, %v31_v54, 0  ;;  %v169_v5 = vsel %vm134_vm1, %v32_v55, 0 }
  0x11   :  { %v317_v6 = vand.u32 4294901760, %v316_v62  ;;  %v3007_v7 = vsub.f32 %v157_v57, %v2992_v63  ;;  %v3009_v8 = vand.u32 4294901760, %v166_v4  ;;  %v3011_v12 = vand.u32 4294901760, %v169_v5  ;;  %2233 = vmatprep.subr.mxu0 %v2911_v20 }
  0x12   :  { %v3018_v14 = vsub.f32 %v160_v58, %v3000_v2  ;;  %v3021_v16 = vsub.f32 %v163_v59, %v3002_v3  ;;  %v172_v17 = vsel %vm134_vm1, %v33_v0, 0  ;;  %v175_v18 = vsel %vm134_vm1, %v34_v1, 0 }
  0x13   :  { %2187 = vmatmul.mubr.f32.gmra.mrb[2].mxu0 %v287_v56  ;;  %v325_v26 = vand.u32 4294901760, %v3007_v7  ;;  %v3027_v35 = vsub.f32 %v166_v4, %v3009_v8  ;;  %v3030_v36 = vsub.f32 %v169_v5, %v3011_v12  ;;  %v3032_v37 = vand.u32 4294901760, %v172_v17 }
  0x14   :  { %2189 = vmatprep.mubr.f32.mxu0 %v297_v60  ;;  %v335_v39 = vand.u32 4294901760, %v3018_v14  ;;  %v345_v43 = vand.u32 4294901760, %v3021_v16  ;;  %v3036_v44 = vand.u32 4294901760, %v175_v18  ;;  %v178_v45 = vsel %vm134_vm1, %v35_v13, 0 }
  0x15   :  { %v326_v46 = vsub.f32 %v3007_v7, %v325_v26  ;;  %v355_v47 = vand.u32 4294901760, %v3027_v35  ;;  %v3044_v48 = vsub.f32 %v172_v17, %v3032_v37  ;;  %v3049_v50 = vand.u32 4294901760, %v178_v45 }
  0x16   :  { %v336_v49 = vsub.f32 %v3018_v14, %v335_v39  ;;  %v346_v54 = vsub.f32 %v3021_v16, %v345_v43  ;;  %v365_v55 = vand.u32 4294901760, %v3030_v36  ;;  %v3059_v56 = vsub.f32 %v175_v18, %v3036_v44 }
  0x17   :  { %2190 = vmatmul.mubr.f32.gmra.mrb[4].mxu0 %v307_v61  ;;  %v327_v52 = vand.u32 4294901760, %v326_v46  ;;  %v356_v58 = vsub.f32 %v3027_v35, %v355_v47  ;;  %v375_v59 = vand.u32 4294901760, %v3044_v48  ;;  %v3066_v60 = vsub.f32 %v178_v45, %v3049_v50 }
  0x18   :  { %2192 = vmatprep.mubr.f32.mxu0 %v317_v6  ;;  %v337_v57 = vand.u32 4294901760, %v336_v49  ;;  %v181_v61 = vsel %vm134_vm1, %v36_v51, 0  ;;  %v347_v0 = vand.u32 4294901760, %v346_v54  ;;  %v366_v1 = vsub.f32 %v3030_v36, %v365_v55 }
  0x19   :  { %v3069_v62 = vand.u32 4294901760, %v181_v61  ;;  %v385_v4 = vand.u32 4294901760, %v3059_v56  ;;  %v357_v5 = vand.u32 4294901760, %v356_v58  ;;  %v376_v6 = vsub.f32 %v3044_v48, %v375_v59 }
  0x1a   :  { %v395_v13 = vand.u32 4294901760, %v3066_v60  ;;  %v367_v18 = vand.u32 4294901760, %v366_v1  ;;  %v39_v1 = vld [vmem:[%s3537_s2 + $0x8] sm:$0xff]  ;;  %vm2835_vm2 = vmmov 0  }
  0x1b   :  { %2193 = vmatmul.mubr.f32.gmra.mrb[6].mxu0 %v327_v52  ;;  %v3080_v17 = vsub.f32 %v181_v61, %v3069_v62  ;;  %v386_v45 = vsub.f32 %v3059_v56, %v385_v4  ;;  %v377_v49 = vand.u32 4294901760, %v376_v6  ;;  %v40_v61 = vld [vmem:[%s3537_s2 + $0x10] sm:$0xff]  ;;  %v42_v6 = vld [vmem:[%s3537_s2 + $0x20] sm:$0xff] }
  0x1c   :  { %2195 = vmatprep.mubr.f32.mxu0 %v337_v57  ;;  %v396_v51 = vsub.f32 %v3066_v60, %v395_v13 }
  0x1d   :  { %v405_v46 = vand.u32 4294901760, %v3080_v17  ;;  %v387_v52 = vand.u32 4294901760, %v386_v45  ;;  %v44_v45 = vld [vmem:[%s3537_s2 + $0x30] sm:$0xff] }
  0x1e   :  { %v397_v57 = vand.u32 4294901760, %v396_v51  ;;  %v46_v51 = vld [vmem:[%s3537_s2 + $0x40] sm:$0xff] }
  0x1f   :  { %2196 = vmatmul.mubr.f32.gmra.mrb[8].mxu0 %v347_v0  ;;  %v406_v54 = vsub.f32 %v3080_v17, %v405_v46  ;;  %v2833_v0 = vmov 0  }
  0x20   :  { %2198 = vmatprep.mubr.f32.mxu0 %v357_v5  ;;  %2803 = vset.pattern.permute.xlu0 %v2833_v0  ;;  %v41_v5 = vld [vmem:[%s3537_s2 + $0x18] sm:$0xff] }
  0x21   :  { %v407_v58 = vand.u32 4294901760, %v406_v54  ;;  %2804 = vset.pattern.permute.xlu1 %v2833_v0  ;;  %v48_v54 = vld [vmem:[%s3537_s2 + $0x50] sm:$0xff]  ;;  %v53_v0 = vld [vmem:[%s3537_s2 + $0x78] sm:$0xff] }
  0x22   :  { %66 = vperm.xlu1 %2804, %v40_v61   ;;  %v52_v61 = vld [vmem:[%s3537_s2 + $0x70] sm:$0xff] }
  0x23   :  { %2199 = vmatmul.mubr.f32.gmra.mrb[10].mxu0 %v367_v18  ;;  %v43_v18 = vld [vmem:[%s3537_s2 + $0x28] sm:$0xff] }
  0x24   :  { %2201 = vmatprep.mubr.f32.mxu0 %v377_v49  ;;  %v45_v49 = vld [vmem:[%s3537_s2 + $0x38] sm:$0xff] }
  0x26   :  { %71 = vperm.xlu1 %2804, %v41_v5  }
  0x27   :  { %2202 = vmatmul.mubr.f32.gmra.mrb[12].mxu0 %v387_v52  ;;  %v47_v52 = vld [vmem:[%s3537_s2 + $0x48] sm:$0xff] }
  0x28   :  { %2204 = vmatprep.mubr.f32.mxu0 %v397_v57  ;;  %v49_v57 = vld [vmem:[%s3537_s2 + $0x58] sm:$0xff] }
  0x2a   :  { %81 = vperm.xlu1 %2804, %v43_v18  }
  0x2b   :  { %2205 = vmatmul.mubr.f32.gmra.mrb[14].mxu0 %v407_v58  ;;  %v50_v58 = vld [vmem:[%s3537_s2 + $0x60] sm:$0xff] }
  0x2c   :  { %2209 = vmatprep.mubr.f32.mxu0 %v2890_v10 }
  0x2e   :  { %91 = vperm.xlu1 %2804, %v45_v49  }
  0x2f   :  { %2210 = vmatmul.mubr.f32.vlgmr.msra.gmra.mrb[0].mxu0 %v2892_v11 }
  0x30   :  { %2234 = vmatpush3.msra.mxu0 %v2911_v20  ;;  %2212 = vmatprep.mubr.f32.mxu0 %v2901_v15  ;;  %v38_v20 = vld [vmem:[%s3537_s2] sm:$0xff] }
  0x31   :  { %2259 = vmatprep.subr.mxu0 %v2888_v9  ;;  %56 = vperm.xlu0 %2803, %v38_v20   ;;  %v51_v20 = vld [vmem:[%s3537_s2 + $0x68] sm:$0xff] }
  0x32   :  { %101 = vperm.xlu1 %2804, %v47_v52  }
  0x33   :  { %2213 = vmatmul.mubr.f32.gmra.mrb[2].mxu0 %v2916_v22 }
  0x34   :  { %2215 = vmatprep.mubr.f32.mxu0 %v2922_v24 }
  0x35   :  { %61 = vperm.xlu0 %2803, %v39_v1   ;;  %v1295_v1 = vld [vmem:[%s3539_s4] sm:$0xff] }
  0x36   :  { %111 = vperm.xlu1 %2804, %v49_v57  }
  0x37   :  { %2216 = vmatmul.mubr.f32.gmra.mrb[4].mxu0 %v2924_v25 }
  0x38   :  { %2218 = vmatprep.mubr.f32.mxu0 %v2942_v34 }
  0x39   :  { %76 = vperm.xlu0 %2803, %v42_v6  }
  0x3a   :  { %121 = vperm.xlu1 %2804, %v51_v20  }
  0x3b   :  { %2219 = vmatmul.mubr.f32.gmra.mrb[6].mxu0 %v2992_v63 }
  0x3c   :  { %2221 = vmatprep.mubr.f32.mxu0 %v3000_v2 }
  0x3d   :  { %86 = vperm.xlu0 %2803, %v44_v45  }
  0x3e   :  { %131 = vperm.xlu1 %2804, %v53_v0  }
  0x3f   :  { %2222 = vmatmul.mubr.f32.gmra.mrb[8].mxu0 %v3002_v3 }
  0x40   :  { %2224 = vmatprep.mubr.f32.mxu0 %v3009_v8 }
  0x41   :  { %96 = vperm.xlu0 %2803, %v46_v51  }
  0x43   :  { %2225 = vmatmul.mubr.f32.gmra.mrb[10].mxu0 %v3011_v12 }
  0x44   :  { %2227 = vmatprep.mubr.f32.mxu0 %v3032_v37 }
  0x45   :  { %106 = vperm.xlu0 %2803, %v48_v54  }
  0x47   :  { %2228 = vmatmul.mubr.f32.gmra.mrb[12].mxu0 %v3036_v44 }
  0x48   :  { %2230 = vmatprep.mubr.f32.mxu0 %v3049_v50 }
  0x49   :  { %116 = vperm.xlu0 %2803, %v50_v58  }
  0x4b   :  { %2231 = vmatmul.mubr.f32.gmra.mrb[14].mxu0 %v3069_v62 }
  0x4c   :  { %2235 = vmatprep.mubr.f32.mxu0 %v2908_v19 }
  0x4d   :  { %126 = vperm.xlu0 %2803, %v52_v61  }
  0x4f   :  { %2236 = vmatmul.mubr.f32.vlgmr.msra.gmra.mrb[0].mxu0 %v2914_v21  ;;  %v1294_v21 = vld [vmem:[%s3538_s3] sm:$0xff]  ;;  %s2837_s3 = smov [#allocation2]  }
  0x50   :  { %2260 = vmatpush3.msra.mxu0 %v2888_v9  ;;  %2238 = vmatprep.mubr.f32.mxu0 %v2920_v23  ;;  %v3252_v23 = vand.u32 4294901760, %v1294_v21  ;;  %s1969_s6 = sshll.u32 %s2837_s3, 4  ;;  %s1970_s6 = int_to_ptr.vmem [resolvable:$true] %s1969_s6 }
  0x51   :  { %2285 = vmatprep.subr.mxu0 %v2929_v28  ;;  %1298 = vperm.xlu0 %2803, %v1295_v1   ;;  %s2809_s7 = scalar_lea.vmem %s1970_s6, 128  ;;  %p2814_p1 = scmp.lt.s32.totalorder %s1970_s6, %s1970_s6 }
  0x52   :  { %p2810_p0 = scmp.ne.s32.totalorder %s1970_s6, %s2809_s7  ;;  %p2815_p2 = scmp.lt.s32.totalorder %s2809_s7, %s2809_s7 }
  0x53   :  { %2239 = vmatmul.mubr.f32.gmra.mrb[2].mxu0 %v2933_v30 }
  0x54   :  { %2241 = vmatprep.mubr.f32.mxu0 %v2937_v32  ;;  %p2816_p3 = por %p2815_p2, %p2814_p1 }
  0x56   :  { %p2817_p4 = pnand %p2816_p3, %p2810_p0 }
  0x57   :  { %2242 = vmatmul.mubr.f32.gmra.mrb[4].mxu0 %v2940_v33 }
  0x58   :  { %2244 = vmatprep.mubr.f32.mxu0 %v2959_v42 }
  0x5b   :  { %2245 = vmatmul.mubr.f32.gmra.mrb[6].mxu0 %v3007_v7 }
  0x5c   :  { %2247 = vmatprep.mubr.f32.mxu0 %v3018_v14 }
  0x5f   :  { %2248 = vmatmul.mubr.f32.gmra.mrb[8].mxu0 %v3021_v16 }
  0x60   :  { %2250 = vmatprep.mubr.f32.mxu0 %v3027_v35 }
  0x63   :  { %2251 = vmatmul.mubr.f32.gmra.mrb[10].mxu0 %v3030_v36 }
  0x64   :  { %2253 = vmatprep.mubr.f32.mxu0 %v3044_v48 }
  0x67   :  { %2254 = vmatmul.mubr.f32.gmra.mrb[12].mxu0 %v3059_v56 }
  0x68   :  { %2256 = vmatprep.mubr.f32.mxu0 %v3066_v60 }
  0x6b   :  { %2257 = vmatmul.mubr.f32.gmra.mrb[14].mxu0 %v3080_v17 }
  0x6c   :  { %2261 = vmatprep.mubr.f32.mxu0 %v255_v27  ;;  %v3255_v27 = vsub.f32 %v1294_v21, %v3252_v23 }
  0x6e   :  { %v3541_v33 = vand.u32 4294901760, %v3255_v27 }
  0x6f   :  { %2262 = vmatmul.mubr.f32.vlgmr.msra.gmra.mrb[0].mxu0 %v265_v29 }
  0x70   :  { %2286 = vmatpush3.msra.mxu0 %v2929_v28  ;;  %2264 = vmatprep.mubr.f32.mxu0 %v275_v31 }
  0x71   :  { %2311 = vmatprep.subr.mxu0 %v2888_v9 }
  0x73   :  { %2265 = vmatmul.mubr.f32.gmra.mrb[2].mxu0 %v285_v38 }
  0x74   :  { %2267 = vmatprep.mubr.f32.mxu0 %v295_v40 }
  0x77   :  { %2268 = vmatmul.mubr.f32.gmra.mrb[4].mxu0 %v305_v41 }
  0x78   :  { %2270 = vmatprep.mubr.f32.mxu0 %v315_v53 }
  0x7b   :  { %2271 = vmatmul.mubr.f32.gmra.mrb[6].mxu0 %v325_v26 }
  0x7c   :  { %2273 = vmatprep.mubr.f32.mxu0 %v335_v39 }
  0x7f   :  { %2274 = vmatmul.mubr.f32.gmra.mrb[8].mxu0 %v345_v43 }
  0x80   :  { %2276 = vmatprep.mubr.f32.mxu0 %v355_v47 }
  0x83   :  { %2277 = vmatmul.mubr.f32.gmra.mrb[10].mxu0 %v365_v55 }
  0x84   :  { %2279 = vmatprep.mubr.f32.mxu0 %v375_v59 }
  0x87   :  { %2280 = vmatmul.mubr.f32.gmra.mrb[12].mxu0 %v385_v4 }
  0x88   :  { %2282 = vmatprep.mubr.f32.mxu0 %v395_v13 }
  0x8b   :  { %2283 = vmatmul.mubr.f32.gmra.mrb[14].mxu0 %v405_v46 }
  0x8c   :  { %2287 = vmatprep.mubr.f32.mxu0 %v2890_v10 }
  0x8f   :  { %2288 = vmatmul.mubr.f32.vlgmr.msra.gmra.mrb[0].mxu0 %v2892_v11 }
  0x90   :  { %2312 = vmatpush3.msra.mxu0 %v2888_v9  ;;  %2290 = vmatprep.mubr.f32.mxu0 %v2901_v15  ;;  %v2834_v9 = vmov 0.0|0.0  }
  0x91   :  { %2547 = vmatprep.subr.bf16.mxu1 %v2834_v9 }
  0x93   :  { %2291 = vmatmul.mubr.f32.gmra.mrb[2].mxu0 %v2916_v22 }
  0x94   :  { %2293 = vmatprep.mubr.f32.mxu0 %v2922_v24 }
  0x97   :  { %2294 = vmatmul.mubr.f32.gmra.mrb[4].mxu0 %v2924_v25 }
  0x98   :  { %2296 = vmatprep.mubr.f32.mxu0 %v2942_v34 }
  0x9b   :  { %2297 = vmatmul.mubr.f32.gmra.mrb[6].mxu0 %v2992_v63 }
  0x9c   :  { %2299 = vmatprep.mubr.f32.mxu0 %v3000_v2 }
  0x9f   :  { %2300 = vmatmul.mubr.f32.gmra.mrb[8].mxu0 %v3002_v3 }
  0xa0   :  { %2302 = vmatprep.mubr.f32.mxu0 %v3009_v8 }
  0xa3   :  { %2303 = vmatmul.mubr.f32.gmra.mrb[10].mxu0 %v3011_v12 }
  0xa4   :  { %2305 = vmatprep.mubr.f32.mxu0 %v3032_v37 }
  0xa7   :  { %2306 = vmatmul.mubr.f32.gmra.mrb[12].mxu0 %v3036_v44 }
  0xa8   :  { %2308 = vmatprep.mubr.f32.mxu0 %v3049_v50 }
  0xab   :  { %2309 = vmatmul.mubr.f32.gmra.mrb[14].mxu0 %v3069_v62 }
  0xac   :  { %2313 = vmatprep.mubr.f32.mxu0 %v2890_v10  ;;  %v3542_v10 = vmov 0.0  }
  0xad   :  { %2369 = vmatprep.mubr.msk.f32.mxu1 %vm2835_vm2, %v3542_v10 }
  0xaf   :  { %2314 = vmatmul.mubr.f32.vlgmr.msra.gmra.mrb[0].mxu0 %v2892_v11  ;;  %v67_v11 = vpop.permute.xlu1 %66 }
  0xb0   :  { %2316 = vmatprep.mubr.f32.mxu0 %v2901_v15  ;;  %v57_v15 = vpop.permute.xlu0 %56 }
  0xb3   :  { %2317 = vmatmul.mubr.f32.gmra.mrb[2].mxu0 %v2916_v22  ;;  %v72_v19 = vpop.permute.xlu1 %71 }
  0xb4   :  { %2319 = vmatprep.mubr.f32.mxu0 %v2922_v24  ;;  %v62_v22 = vpop.permute.xlu0 %61 }
  0xb7   :  { %2320 = vmatmul.mubr.f32.gmra.mrb[4].mxu0 %v2924_v25  ;;  %v82_v24 = vpop.permute.xlu1 %81 }
  0xb8   :  { %2322 = vmatprep.mubr.f32.mxu0 %v2942_v34  ;;  %v77_v25 = vpop.permute.xlu0 %76 }
  0xbb   :  { %2323 = vmatmul.mubr.f32.gmra.mrb[6].mxu0 %v2992_v63  ;;  %v92_v34 = vpop.permute.xlu1 %91 }
  0xbc   :  { %2325 = vmatprep.mubr.f32.mxu0 %v3000_v2  ;;  %v87_v41 = vpop.permute.xlu0 %86 }
  0xbf   :  { %2326 = vmatmul.mubr.f32.gmra.mrb[8].mxu0 %v3002_v3 }
  0xc0   :  { %2328 = vmatprep.mubr.f32.mxu0 %v3009_v8  ;;  %v97_v56 = vpop.permute.xlu0 %96 }
  0xc3   :  { %2329 = vmatmul.mubr.f32.gmra.mrb[10].mxu0 %v3011_v12  ;;  %v3263_v12 = vsub.f32 %v3255_v27, %v3541_v33 }
  0xc4   :  { %2331 = vmatprep.mubr.f32.mxu0 %v3032_v37 }
  0xc7   :  { %2332 = vmatmul.mubr.f32.gmra.mrb[12].mxu0 %v3036_v44  ;;  %v102_v44 = vpop.permute.xlu1 %101 }
  0xc8   :  { %2334 = vmatprep.mubr.f32.mxu0 %v3049_v50 }
  0xcb   :  { %2335 = vmatmul.mubr.f32.gmra.mrb[14].mxu0 %v3069_v62 }
 0x182   :  { %v2315_v28 = vpop.f32.mrb[0].mxu0 }
 0x183   :  { %v2691_v29 = vadd.f32 %v2315_v28, %v62_v22  ;;  %v1184_v30 = vpop.f32.mrb[1].mxu0  ;;  %v107_v28 = vpop.permute.xlu0 %106 }
 0x184   :  { %v2692_v31 = vadd.f32 %v1184_v30, %v57_v15  ;;  %v112_v15 = vpop.permute.xlu1 %111 }
 0x185   :  { %v1279_v32 = vmax.f32 %v2691_v29, 0.0 }
 0x186   :  { %v1278_v38 = vmax.f32 %v2692_v31, 0.0  ;;  %v2318_v40 = vpop.f32.mrb[2].mxu0 }
 0x187   :  { %v1305_v42 = vand.u32 4294901760, %v1279_v32  ;;  %v2693_v53 = vadd.f32 %v2318_v40, %v72_v19  ;;  %v1196_v63 = vpop.f32.mrb[3].mxu0 }
 0x188   :  { %v1302_v2 = vand.u32 4294901760, %v1278_v38  ;;  %v2694_v3 = vadd.f32 %v1196_v63, %v67_v11 }
 0x189   :  { %v3258_v7 = vsub.f32 %v1279_v32, %v1305_v42  ;;  %v1281_v8 = vmax.f32 %v2693_v53, 0.0 }
 0x18a   :  { %v3265_v14 = vsub.f32 %v1278_v38, %v1302_v2  ;;  %v1280_v16 = vmax.f32 %v2694_v3, 0.0  ;;  %v2321_v26 = vpop.f32.mrb[4].mxu0  ;;  %v3267_v35 = vpack.c.bf16 %v1305_v42, %v1302_v2 }
 0x18b   :  { %v1402_v36 = vand.u32 4294901760, %v3258_v7  ;;  %v1311_v37 = vand.u32 4294901760, %v1281_v8  ;;  %v2695_v39 = vadd.f32 %v2321_v26, %v82_v24  ;;  %v1208_v43 = vpop.f32.mrb[5].mxu0 }
 0x18c   :  { %v1395_v47 = vand.u32 4294901760, %v3265_v14  ;;  %v1308_v48 = vand.u32 4294901760, %v1280_v16  ;;  %v2696_v50 = vadd.f32 %v1208_v43, %v77_v25  ;;  %2549 = vmatpush3.bf16.msra.mxu1 %v3267_v35 }
 0x18d   :  { %v1403_v59 = vsub.f32 %v3258_v7, %v1402_v36  ;;  %v3277_v60 = vsub.f32 %v1281_v8, %v1311_v37  ;;  %v1283_v62 = vmax.f32 %v2695_v39, 0.0  ;;  %2550 = vmatprep.subr.bf16.mxu1 %v2834_v9 }
 0x18e   :  { %v1396_v13 = vsub.f32 %v3265_v14, %v1395_v47  ;;  %v3284_v17 = vsub.f32 %v1280_v16, %v1308_v48  ;;  %v1282_v46 = vmax.f32 %v2696_v50, 0.0  ;;  %v2324_v5 = vpop.f32.mrb[6].mxu0  ;;  %v3286_v6 = vpack.c.bf16 %v1311_v37, %v1308_v48 }
 0x18f   :  { %v1404_v18 = vand.u32 4294901760, %v1403_v59  ;;  %v1416_v45 = vand.u32 4294901760, %v3277_v60  ;;  %v1317_v49 = vand.u32 4294901760, %v1283_v62  ;;  %v2697_v51 = vadd.f32 %v2324_v5, %v92_v34  ;;  %v1220_v52 = vpop.f32.mrb[7].mxu0  ;;  %v122_v59 = vpop.permute.xlu1 %121 }
 0x190   :  { %v1397_v54 = vand.u32 4294901760, %v1396_v13  ;;  %v1409_v57 = vand.u32 4294901760, %v3284_v17  ;;  %v1314_v58 = vand.u32 4294901760, %v1282_v46  ;;  %v2698_v20 = vadd.f32 %v1220_v52, %v87_v41  ;;  %2552 = vmatpush3.bf16.msra.mxu1 %v3286_v6 }
 0x191   :  { %v1417_v61 = vsub.f32 %v3277_v60, %v1416_v45  ;;  %v3294_v0 = vsub.f32 %v1283_v62, %v1317_v49  ;;  %v1285_v1 = vmax.f32 %v2697_v51, 0.0  ;;  %2553 = vmatprep.subr.bf16.mxu1 %v2834_v9 }
 0x192   :  { %v1410_v19 = vsub.f32 %v3284_v17, %v1409_v57  ;;  %v3302_v21 = vsub.f32 %v1282_v46, %v1314_v58  ;;  %v1284_v22 = vmax.f32 %v2698_v20, 0.0  ;;  %v2327_v24 = vpop.f32.mrb[8].mxu0  ;;  %v3304_v25 = vpack.c.bf16 %v1317_v49, %v1314_v58 }
 0x193   :  { %v1418_v29 = vand.u32 4294901760, %v1417_v61  ;;  %v1430_v30 = vand.u32 4294901760, %v3294_v0  ;;  %v1323_v31 = vand.u32 4294901760, %v1285_v1  ;;  %v2699_v32 = vadd.f32 %v2327_v24, %v102_v44  ;;  %v1232_v34 = vpop.f32.mrb[9].mxu0 }
 0x194   :  { %v1411_v38 = vand.u32 4294901760, %v1410_v19  ;;  %v1423_v40 = vand.u32 4294901760, %v3302_v21  ;;  %v1320_v41 = vand.u32 4294901760, %v1284_v22  ;;  %v2700_v42 = vadd.f32 %v1232_v34, %v97_v56  ;;  %2555 = vmatpush3.bf16.msra.mxu1 %v3304_v25 }
 0x195   :  { %v1431_v53 = vsub.f32 %v3294_v0, %v1430_v30  ;;  %v3312_v63 = vsub.f32 %v1285_v1, %v1323_v31  ;;  %v1287_v2 = vmax.f32 %v2699_v32, 0.0  ;;  %2556 = vmatprep.subr.bf16.mxu1 %v2834_v9  ;;  %v3315_v3 = vpack.c.bf16 %v1404_v18, %v1397_v54  ;;  %v117_v18 = vpop.permute.xlu0 %116 }
 0x196   :  { %v1424_v8 = vsub.f32 %v3302_v21, %v1423_v40  ;;  %v3320_v16 = vsub.f32 %v1284_v22, %v1320_v41  ;;  %v1286_v26 = vmax.f32 %v2700_v42, 0.0  ;;  %v2330_v37 = vpop.f32.mrb[10].mxu0  ;;  %v3322_v39 = vpack.c.bf16 %v1323_v31, %v1320_v41 }
 0x197   :  { %v1432_v43 = vand.u32 4294901760, %v1431_v53  ;;  %v1444_v44 = vand.u32 4294901760, %v3312_v63  ;;  %v1329_v48 = vand.u32 4294901760, %v1287_v2  ;;  %v2701_v50 = vadd.f32 %v2330_v37, %v112_v15  ;;  %v1244_v56 = vpop.f32.mrb[11].mxu0 }
 0x198   :  { %v1425_v62 = vand.u32 4294901760, %v1424_v8  ;;  %v1437_v13 = vand.u32 4294901760, %v3320_v16  ;;  %v1326_v46 = vand.u32 4294901760, %v1286_v26  ;;  %v2702_v5 = vadd.f32 %v1244_v56, %v107_v28  ;;  %2558 = vmatpush3.bf16.msra.mxu1 %v3322_v39  ;;  %v132_v8 = vpop.permute.xlu1 %131 }
 0x199   :  { %v1445_v49 = vsub.f32 %v3312_v63, %v1444_v44  ;;  %v3330_v51 = vsub.f32 %v1287_v2, %v1329_v48  ;;  %v1289_v52 = vmax.f32 %v2701_v50, 0.0  ;;  %2559 = vmatprep.subr.bf16.mxu1 %v2834_v9  ;;  %v3333_v54 = vpack.c.bf16 %v1418_v29, %v1411_v38 }
 0x19a   :  { %v1438_v58 = vsub.f32 %v3320_v16, %v1437_v13  ;;  %v3338_v20 = vsub.f32 %v1286_v26, %v1326_v46  ;;  %v1288_v61 = vmax.f32 %v2702_v5, 0.0  ;;  %v2333_v1 = vpop.f32.mrb[12].mxu0  ;;  %v3340_v15 = vpack.c.bf16 %v1329_v48, %v1326_v46 }
 0x19b   :  { %v1446_v19 = vand.u32 4294901760, %v1445_v49  ;;  %v3544_v22 = vand.u32 4294901760, %v3330_v51  ;;  %v1335_v24 = vand.u32 4294901760, %v1289_v52  ;;  %v2703_v28 = vadd.f32 %v2333_v1, %v122_v59  ;;  %v1256_v31 = vpop.f32.mrb[13].mxu0  ;;  %v127_v59 = vpop.permute.xlu0 %126 }
 0x19c   :  { %v1439_v32 = vand.u32 4294901760, %v1438_v58  ;;  %v1451_v29 = vand.u32 4294901760, %v3338_v20  ;;  %v1332_v34 = vand.u32 4294901760, %v1288_v61  ;;  %v2704_v38 = vadd.f32 %v1256_v31, %v117_v18  ;;  %2561 = vmatpush3.bf16.msra.mxu1 %v3340_v15 }
 0x19d   :  { %v1459_v41 = vsub.f32 %v3330_v51, %v3544_v22  ;;  %v3348_v42 = vsub.f32 %v1289_v52, %v1335_v24  ;;  %v1291_v53 = vmax.f32 %v2703_v28, 0.0  ;;  %2562 = vmatprep.subr.bf16.mxu1 %v2834_v9  ;;  %v3351_v2 = vpack.c.bf16 %v1432_v43, %v1425_v62 }
 0x19e   :  { %v1452_v26 = vsub.f32 %v3338_v20, %v1451_v29  ;;  %v3356_v37 = vsub.f32 %v1288_v61, %v1332_v34  ;;  %v1290_v48 = vmax.f32 %v2704_v38, 0.0  ;;  %v2336_v50 = vpop.f32.mrb[14].mxu0  ;;  %v3358_v56 = vpack.c.bf16 %v1335_v24, %v1332_v34 }
 0x19f   :  { %v1460_v46 = vand.u32 4294901760, %v1459_v41  ;;  %v1472_v5 = vand.u32 4294901760, %v3348_v42  ;;  %v1341_v18 = vand.u32 4294901760, %v1291_v53  ;;  %v2705_v49 = vadd.f32 %v2336_v50, %v132_v8  ;;  %v1268_v52 = vpop.f32.mrb[15].mxu0 }
 0x1a0   :  { %v1453_v43 = vand.u32 4294901760, %v1452_v26  ;;  %v1465_v62 = vand.u32 4294901760, %v3356_v37  ;;  %v1338_v58 = vand.u32 4294901760, %v1290_v48  ;;  %v2706_v1 = vadd.f32 %v1268_v52, %v127_v59  ;;  %2564 = vmatpush3.bf16.msra.mxu1 %v3358_v56 }
 0x1a1   :  { %v1473_v61 = vsub.f32 %v3348_v42, %v1472_v5  ;;  %v3364_v28 = vsub.f32 %v1291_v53, %v1341_v18  ;;  %v1293_v24 = vmax.f32 %v2705_v49, 0.0  ;;  %2565 = vmatprep.subr.bf16.mxu1 %v2834_v9  ;;  %v2581_v31 = vpack.c.bf16 %v1446_v19, %v1439_v32 }
 0x1a2   :  { %v1466_v34 = vsub.f32 %v3356_v37, %v1465_v62  ;;  %v3368_v38 = vsub.f32 %v1290_v48, %v1338_v58  ;;  %v1292_v41 = vmax.f32 %v2706_v1, 0.0  ;;  %v3370_v8 = vpack.c.bf16 %v1341_v18, %v1338_v58 }
 0x1a3   :  { %v1474_v26 = vand.u32 4294901760, %v1473_v61  ;;  %v1486_v50 = vand.u32 4294901760, %v3364_v28  ;;  %v1347_v59 = vand.u32 4294901760, %v1293_v24  ;;  %v2584_v52 = vpack.c.bf16 %v1460_v46, %v1453_v43 }
 0x1a4   :  { %v1467_v33 = vand.u32 4294901760, %v1466_v34  ;;  %v1479_v53 = vand.u32 4294901760, %v3368_v38  ;;  %v1344_v11 = vand.u32 4294901760, %v1292_v41  ;;  %2567 = vmatpush3.bf16.msra.mxu1 %v3370_v8  ;;  %v2602_v19 = vpack.c.bf16 %v3294_v0, %v3302_v21 }
 0x1a5   :  { %v1487_v32 = vsub.f32 %v3364_v28, %v1486_v50  ;;  %v3378_v48 = vsub.f32 %v1293_v24, %v1347_v59  ;;  %2568 = vmatprep.subr.bf16.mxu1 %v2834_v9  ;;  %v2605_v18 = vpack.c.bf16 %v3312_v63, %v3320_v16  ;;  %v2608_v46 = vpack.c.bf16 %v3330_v51, %v3338_v20 }
 0x1a6   :  { %v1480_v49 = vsub.f32 %v3368_v38, %v1479_v53  ;;  %v1492_v43 = vsub.f32 %v1292_v41, %v1344_v11  ;;  %v3386_v58 = vpack.c.bf16 %v1347_v59, %v1344_v11  ;;  %v2587_v1 = vpack.c.bf16 %v1474_v26, %v1467_v33 }
 0x1a7   :  { %v1488_v61 = vand.u32 4294901760, %v1487_v32  ;;  %v1500_v34 = vand.u32 4294901760, %v3378_v48  ;;  %v2611_v24 = vpack.c.bf16 %v3348_v42, %v3356_v37  ;;  %v2614_v55 = vpack.c.bf16 %v3364_v28, %v3368_v38 }
 0x1a8   :  { %v1481_v10 = vand.u32 4294901760, %v1480_v49  ;;  %v1493_v4 = vand.u32 4294901760, %v1492_v43  ;;  %2570 = vmatpush3.bf16.msra.mxu1 %v3386_v58  ;;  %v2617_v22 = vpack.c.bf16 %v3378_v48, %v1492_v43  ;;  %v3399_v33 = vpack.c.bf16 %v1402_v36, %v1395_v47 }
 0x1a9   :  { %v1501_v11 = vsub.f32 %v3378_v48, %v1500_v34  ;;  %2571 = vmatprep.subr.bf16.mxu1 %v2834_v9  ;;  %v3407_v42 = vpack.c.bf16 %v1416_v45, %v1409_v57  ;;  %v3413_v37 = vpack.c.bf16 %v1430_v30, %v1423_v40  ;;  %v3419_v36 = vpack.c.bf16 %v1444_v44, %v1437_v13 }
 0x1aa   :  { %v1494_v47 = vsub.f32 %v1492_v43, %v1493_v4  ;;  %v2590_v28 = vpack.c.bf16 %v1488_v61, %v1481_v10  ;;  %v3545_v38 = vand.u32 4294901760, %v3330_v51  ;;  %v3427_v57 = vpack.c.bf16 %v1472_v5, %v1465_v62 }
 0x1ab   :  { %v1502_v21 = vand.u32 4294901760, %v1501_v11  ;;  %v3546_v0 = vand.u32 4294901760, %v3263_v12  ;;  %v3431_v30 = vpack.c.bf16 %v1486_v50, %v1479_v53  ;;  %v3433_v40 = vpack.c.bf16 %v1500_v34, %v1493_v4 }
 0x1ac   :  { %v3425_v45 = vpack.c.bf16 %v3545_v38, %v1451_v29  ;;  %v1495_v63 = vand.u32 4294901760, %v1494_v47  ;;  %v3547_v10 = vmov 0.0   ;;  %v3548_v12 = vpack.c.bf16 %v3258_v7, %v3265_v14 }
 0x1ad   :  { %2370 = vmatmul.mubr.f32.vlgmr.msra.gmra.mrb[0].mxu1 %v3546_v0  ;;  %v3549_v4 = vpack.c.bf16 %v3277_v60, %v3284_v17  ;;  %v3550_v7 = vand.u32 4294901760, %v3255_v27 }
 0x1ae   :  { %2573 = vmatpush3.bf16.msra.mxu1 %v3315_v3  ;;  %2404 = vmatprep.mubr.msk.f32.mxu1 %vm2835_vm2, %v3547_v10  ;;  %v2593_v16 = vpack.c.bf16 %v1502_v21, %v1495_v63 }
 0x1af   :  { %2574 = vmatprep.subr.bf16.mxu1 %v2834_v9 }
 0x1b2   :  { %2576 = vmatpush3.bf16.msra.mxu1 %v3333_v54 }
 0x1b3   :  { %2577 = vmatprep.subr.bf16.mxu1 %v2834_v9 }
 0x1b6   :  { %2579 = vmatpush3.bf16.msra.mxu1 %v3351_v2 }
 0x1b7   :  { %2580 = vmatprep.subr.bf16.mxu1 %v2834_v9 }
 0x1ba   :  { %2582 = vmatpush3.bf16.msra.mxu1 %v2581_v31 }
 0x1bb   :  { %2583 = vmatprep.subr.bf16.mxu1 %v2834_v9 }
 0x1be   :  { %2585 = vmatpush3.bf16.msra.mxu1 %v2584_v52 }
 0x1bf   :  { %2586 = vmatprep.subr.bf16.mxu1 %v2834_v9 }
 0x1c2   :  { %2588 = vmatpush3.bf16.msra.mxu1 %v2587_v1 }
 0x1c3   :  { %2589 = vmatprep.subr.bf16.mxu1 %v2834_v9 }
 0x1c6   :  { %2591 = vmatpush3.bf16.msra.mxu1 %v2590_v28 }
 0x1c7   :  { %2592 = vmatprep.subr.bf16.mxu1 %v2834_v9 }
 0x1ca   :  { %2594 = vmatpush3.bf16.msra.mxu1 %v2593_v16 }
 0x1cb   :  { %2595 = vmatprep.subr.bf16.mxu1 %v2834_v9 }
 0x1cd   :  { %2405 = vmatmul.mubr.f32.vlgmr.msra.gmra.mrb[0].mxu1 %v3252_v23 }
 0x1ce   :  { %2597 = vmatpush3.bf16.msra.mxu1 %v3548_v12  ;;  %2439 = vmatprep.mubr.msk.f32.mxu1 %vm2835_vm2, %v3547_v10 }
 0x1cf   :  { %2598 = vmatprep.subr.bf16.mxu1 %v2834_v9 }
 0x1d2   :  { %2600 = vmatpush3.bf16.msra.mxu1 %v3549_v4 }
 0x1d3   :  { %2601 = vmatprep.subr.bf16.mxu1 %v2834_v9 }
 0x1d6   :  { %2603 = vmatpush3.bf16.msra.mxu1 %v2602_v19 }
 0x1d7   :  { %2604 = vmatprep.subr.bf16.mxu1 %v2834_v9 }
 0x1da   :  { %2606 = vmatpush3.bf16.msra.mxu1 %v2605_v18 }
 0x1db   :  { %2607 = vmatprep.subr.bf16.mxu1 %v2834_v9 }
 0x1de   :  { %2609 = vmatpush3.bf16.msra.mxu1 %v2608_v46 }
 0x1df   :  { %2610 = vmatprep.subr.bf16.mxu1 %v2834_v9 }
 0x1e2   :  { %2612 = vmatpush3.bf16.msra.mxu1 %v2611_v24 }
 0x1e3   :  { %2613 = vmatprep.subr.bf16.mxu1 %v2834_v9 }
 0x1e6   :  { %2615 = vmatpush3.bf16.msra.mxu1 %v2614_v55 }
 0x1e7   :  { %2616 = vmatprep.subr.bf16.mxu1 %v2834_v9 }
 0x1ea   :  { %2618 = vmatpush3.bf16.msra.mxu1 %v2617_v22 }
 0x1eb   :  { %2619 = vmatprep.subr.bf16.mxu1 %v2834_v9 }
 0x1ed   :  { %2440 = vmatmul.mubr.f32.vlgmr.msra.gmra.mrb[0].mxu1 %v3255_v27  ;;  %v1299_v27 = vpop.permute.xlu0 %1298 }
 0x1ee   :  { %2621 = vmatpush3.bf16.msra.mxu1 %v3267_v35  ;;  %2474 = vmatprep.mubr.msk.f32.mxu1 %vm2835_vm2, %v3547_v10 }
 0x1ef   :  { %2622 = vmatprep.subr.bf16.mxu1 %v2834_v9 }
 0x1f2   :  { %2624 = vmatpush3.bf16.msra.mxu1 %v3286_v6 }
 0x1f3   :  { %2625 = vmatprep.subr.bf16.mxu1 %v2834_v9 }
 0x1f6   :  { %2627 = vmatpush3.bf16.msra.mxu1 %v3304_v25 }
 0x1f7   :  { %2628 = vmatprep.subr.bf16.mxu1 %v2834_v9 }
 0x1fa   :  { %2630 = vmatpush3.bf16.msra.mxu1 %v3322_v39 }
 0x1fb   :  { %2631 = vmatprep.subr.bf16.mxu1 %v2834_v9 }
 0x1fe   :  { %2633 = vmatpush3.bf16.msra.mxu1 %v3340_v15 }
 0x1ff   :  { %2634 = vmatprep.subr.bf16.mxu1 %v2834_v9 }
 0x202   :  { %2636 = vmatpush3.bf16.msra.mxu1 %v3358_v56 }
 0x203   :  { %2637 = vmatprep.subr.bf16.mxu1 %v2834_v9 }
 0x206   :  { %2639 = vmatpush3.bf16.msra.mxu1 %v3370_v8 }
 0x207   :  { %2640 = vmatprep.subr.bf16.mxu1 %v2834_v9 }
 0x20a   :  { %2642 = vmatpush3.bf16.msra.mxu1 %v3386_v58 }
 0x20b   :  { %2643 = vmatprep.subr.bf16.mxu1 %v2834_v9 }
 0x20d   :  { %2475 = vmatmul.mubr.f32.vlgmr.msra.gmra.mrb[0].mxu1 %v3550_v7 }
 0x20e   :  { %2645 = vmatpush3.bf16.msra.mxu1 %v3399_v33  ;;  %2509 = vmatprep.mubr.msk.f32.mxu1 %vm2835_vm2, %v3547_v10 }
 0x20f   :  { %2646 = vmatprep.subr.bf16.mxu1 %v2834_v9 }
 0x212   :  { %2648 = vmatpush3.bf16.msra.mxu1 %v3407_v42 }
 0x213   :  { %2649 = vmatprep.subr.bf16.mxu1 %v2834_v9 }
 0x216   :  { %2651 = vmatpush3.bf16.msra.mxu1 %v3413_v37 }
 0x217   :  { %2652 = vmatprep.subr.bf16.mxu1 %v2834_v9 }
 0x21a   :  { %2654 = vmatpush3.bf16.msra.mxu1 %v3419_v36 }
 0x21b   :  { %2655 = vmatprep.subr.bf16.mxu1 %v2834_v9 }
 0x21e   :  { %2657 = vmatpush3.bf16.msra.mxu1 %v3425_v45 }
 0x21f   :  { %2658 = vmatprep.subr.bf16.mxu1 %v2834_v9 }
 0x222   :  { %2660 = vmatpush3.bf16.msra.mxu1 %v3427_v57 }
 0x223   :  { %2661 = vmatprep.subr.bf16.mxu1 %v2834_v9 }
 0x226   :  { %2663 = vmatpush3.bf16.msra.mxu1 %v3431_v30 }
 0x227   :  { %2664 = vmatprep.subr.bf16.mxu1 %v2834_v9 }
 0x22a   :  { %2666 = vmatpush3.bf16.msra.mxu1 %v3433_v40 }
 0x22b   :  { %2667 = vmatprep.subr.bf16.mxu1 %v2834_v9 }
 0x22d   :  { %2510 = vmatmul.mubr.f32.vlgmr.msra.gmra.mrb[0].mxu1 %v3252_v23 }
 0x22e   :  { %2669 = vmatpush3.bf16.msra.mxu1 %v3267_v35  ;;  %2544 = vmatprep.mubr.msk.f32.mxu1 %vm2835_vm2, %v3547_v10 }
 0x22f   :  { %2670 = vmatprep.subr.bf16.mxu1 %v2834_v9 }
 0x232   :  { %2672 = vmatpush3.bf16.msra.mxu1 %v3286_v6 }
 0x233   :  { %2673 = vmatprep.subr.bf16.mxu1 %v2834_v9 }
 0x236   :  { %2675 = vmatpush3.bf16.msra.mxu1 %v3304_v25 }
 0x237   :  { %2676 = vmatprep.subr.bf16.mxu1 %v2834_v9 }
 0x23a   :  { %2678 = vmatpush3.bf16.msra.mxu1 %v3322_v39 }
 0x23b   :  { %2679 = vmatprep.subr.bf16.mxu1 %v2834_v9 }
 0x23e   :  { %2681 = vmatpush3.bf16.msra.mxu1 %v3340_v15 }
 0x23f   :  { %2682 = vmatprep.subr.bf16.mxu1 %v2834_v9 }
 0x242   :  { %2684 = vmatpush3.bf16.msra.mxu1 %v3358_v56 }
 0x243   :  { %2685 = vmatprep.subr.bf16.mxu1 %v2834_v9 }
 0x246   :  { %2687 = vmatpush3.bf16.msra.mxu1 %v3370_v8 }
 0x247   :  { %2688 = vmatprep.subr.bf16.mxu1 %v2834_v9 }
 0x24a   :  { %2690 = vmatpush3.bf16.msra.mxu1 %v3386_v58 }
 0x24d   :  { %2545 = vmatmul.mubr.f32.vlgmr.msra.gmra.mrb[0].mxu1 %v3252_v23 }
 0x320   :  { %v1938_v14 = vpop.f32.mrb[0].mxu1 }
 0x321   :  { %v2707_v35 = vadd.f32 %v1938_v14, %v1299_v27  ;;  %v2546_v55 = vpop.f32.mrb[1].mxu1 }
 0x323   :  { %v1942_v60 = vrot.slane %v2707_v35, 4 }
 0x325   :  { %v1943_v17 = vmax.f32 %v2707_v35, %v1942_v60 }
 0x327   :  { %v1944_v6 = vrot.slane %v1943_v17, 2 }
 0x329   :  { %v1945_v25 = vmax.f32 %v1943_v17, %v1944_v6 }
 0x32b   :  { %v1946_v3 = vrot.slane %v1945_v25, 1 }
 0x32d   :  { %v1947_v39 = vmax.f32 %v1945_v25, %v1946_v3 }
 0x32f   :  { %v1948_v44 = vsub.f32 %v2707_v35, %v1947_v39 }
 0x331   :  { %v1949_v13 = vmul.f32 1.442695, %v1948_v44 }
 0x333   :  { %2805 = vpow2.f32 %v1949_v13 }
 0x33d   :  { %v2806_v51 = vpop.eup %2805 }
 0x33e   :  { %v1951_v54 = vrot.slane %v2806_v51, 4 }
 0x340   :  { %v1952_v9 = vadd.f32 %v2806_v51, %v1951_v54 }
 0x342   :  { %v1953_v20 = vrot.slane %v1952_v9, 2 }
 0x344   :  { %v1954_v15 = vadd.f32 %v1953_v20, %v1952_v9 }
 0x346   :  { %v1955_v22 = vrot.slane %v1954_v15, 1 }
 0x348   :  { %v1956_v23 = vadd.f32 %v1955_v22, %v1954_v15 }
 0x34a   :  { %2807 = vrcp.f32 %v1956_v23 }
 0x354   :  { %v2808_v29 = vpop.eup %2807 }
 0x355   :  { %v1958_v2 = vmul.f32 %v2808_v29, %v1956_v23 }
 0x357   :  { %v1959_v56 = vsub.f32 2.0, %v1958_v2 }
 0x359   :  { %v1960_v5 = vmul.f32 %v2808_v29, %v1959_v56 }
 0x35b   :  { %v1961_v62 = vmul.f32 %v2806_v51, %v1960_v5 }
 0x35d   :  { %1962 = vst [vmem:[#allocation2] sm:$0xff] %v1961_v62 }
 0x35e   :  { %2820 = shalt.err (!%p2817_p4)
}
 0x35f   :  { %s2821_s10 = scalar_lea.hbm %s3540_s5, 128 }
 0x360   :  { %p2822_p5 = scmp.ne.s32.totalorder %s3540_s5, %s2821_s10  ;;  %p2825_p6 = scmp.lt.u32.totalorder %s2821_s10, %s3540_s5 }
 0x362   :  { %p2827_p7 = pnand %p2825_p6, %p2822_p5 }
 0x364   :  { %2830 = shalt.err (!%p2827_p7)
}
 0x365   :  { %1972 = dma.vmem_to_hbm [thread:$0]  %s1970_s6, 128, %s3540_s5, [#allocation3]  }
 0x366   :  { %2831 = dma.done.wait [#allocation3], 128  }
 0x367   :  { %2832 = vsyncadd [#allocation3], 4294967168 }
 0x368   :  { %1976 = vsyncpa [#allocation3], 1 }

</bundles_post_ra>
